<compile_context>
chip_gen: v7x
topology: tpu7x:2x2x1
jax: 0.10.0
libtpu: 0.0.40
codegen_flags: <defaults>
</compile_context>

<pallas_src>
import functools

import jax
import jax.numpy as jnp
from jax.experimental import pallas as pl
from jax.experimental.pallas import tpu as pltpu


# ----------------------------- kernel ---------------------------------------

def _ffn_kernel(x_ref, g_ref, beta_ref, w1_ref, b1_ref, w2_ref, b2_ref, o_ref,
                xn_ref, acc_ref, *, eps, compute_dtype, activation):
    k = pl.program_id(1)
    nk = pl.num_programs(1)

    # --- once per row tile: LayerNorm (f32 VPU math), cache xn, zero the acc ---
    @pl.when(k == 0)
    def _():
        x = x_ref[...].astype(jnp.float32)
        mean = jnp.mean(x, axis=-1, keepdims=True)
        centered = x - mean
        var = jnp.mean(centered * centered, axis=-1, keepdims=True)
        inv_std = jax.lax.rsqrt(var + eps)
        # Fold gamma into the normalizer so scale + normalize share one VPU pass.
        xn = centered * (inv_std * g_ref[...]) + beta_ref[...]
        xn_ref[...] = xn.astype(compute_dtype)
        acc_ref[...] = jnp.zeros_like(acc_ref)

    # --- per ff tile: h = act(xn @ w1_k + b1_k); acc += h @ w2_k -------------
    h = jnp.dot(xn_ref[...], w1_ref[...],
                preferred_element_type=jnp.float32) + b1_ref[...]
    if activation == "relu":
        h = jnp.maximum(h, 0.0)                      # dropout_1 = identity (inference)
    else:  # "gelu" -- F.gelu default is the exact (erf) form
        h = jax.nn.gelu(h, approximate=False)
    h = h.astype(compute_dtype)                      # only live copy of h -> MXU
    acc_ref[...] += jnp.dot(h, w2_ref[...], preferred_element_type=jnp.float32)

    # --- last ff tile: bias + residual, lane-dense full-tile store -----------
    @pl.when(k == nk - 1)
    def _():
        y = acc_ref[...] + b2_ref[...] + x_ref[...].astype(jnp.float32)
        o_ref[...] = y.astype(o_ref.dtype)           # dropout_2 = identity


# ------------------------- generation-aware sizing --------------------------

def _tpu_generation_params():
    """Best-effort (vmem_capacity_bytes, mxu_m, min_grid_steps) for local TPU."""
    vmem_cap = None
    try:
        info = pltpu.get_tpu_info()
        vmem_cap = getattr(info, "vmem_capacity_bytes", None)
    except Exception:
        pass
    kind = ""
    try:
        kind = (getattr(jax.devices()[0], "device_kind", "") or "").lower()
    except Exception:
        pass
    is_v7 = ("v7" in kind) or ("7x" in kind)
    is_v6 = "v6" in kind
    if vmem_cap is None:
        vmem_cap = (64 << 20) if is_v7 else (128 << 20)
    # MXU M dimension: 256 on v6e/v7x (2x256^2), 128 on v5e and older (4x128^2).
    mxu_m = 256 if (is_v6 or is_v7 or kind == "") else (128 if "v5" in kind or "v4" in kind
                                                        or "v3" in kind or "v2" in kind else 256)
    # v7x has 2 TensorCores per chip: keep >=2 pipelined steps per core.
    min_steps = 4 if is_v7 else 2
    return int(vmem_cap), mxu_m, min_steps


def _choose_tile_rows(rows, mxu_m, min_steps):
    # Prefer large tiles (fill the 256-wide MXU on v6e/v7x, amortize ~0.35us/step)
    # while keeping at least `min_steps` grid steps for pipelining / megacore.
    for cand in (1024, 512, 256, 128, 64, 32, 16, 8):
        if rows >= min_steps * cand:
            return cand
    if rows >= 8:
        return 8
    return rows  # tiny input: one full-extent tile (equals array dim -> legal)


def _vmem_needed(tile_rows, tile_ff, d_model, x_itemsize, w_itemsize, n_ff):
    wbuf = 1 if n_ff == 1 else 2                    # constant blocks -> single buffer
    x_b = 2 * tile_rows * d_model * x_itemsize       # x tile (double-buffered)
    o_b = 2 * tile_rows * d_model * x_itemsize       # out tile
    w1_b = wbuf * d_model * tile_ff * w_itemsize
    w2_b = wbuf * tile_ff * d_model * w_itemsize
    b1_b = wbuf * tile_ff * 4
    small = 3 * d_model * 4                          # gamma, beta, b2 (single-buffered)
    xn_b = tile_rows * d_model * w_itemsize          # cached LayerNorm output
    acc_b = tile_rows * d_model * 4                  # f32 accumulator
    h_b = tile_rows * tile_ff * (4 + w_itemsize)     # f32 h + compute-dtype copy
    return x_b + o_b + w1_b + w2_b + b1_b + small + xn_b + acc_b + h_b


def _choose_tile_ff(d_ff, tile_rows, d_model, x_itemsize, w_itemsize, budget):
    cands = [d_ff] + [c for c in (8192, 4096, 2048, 1024, 512, 256, 128)
                      if c < d_ff and d_ff % c == 0]
    for tf in cands:
        n_ff = d_ff // tf
        if _vmem_needed(tile_rows, tf, d_model, x_itemsize, w_itemsize, n_ff) <= budget:
            return tf
    return None


def _spec(shape, index_map, single_buffer=False):
    """BlockSpec, single-buffered for grid-invariant operands when supported."""
    if single_buffer:
        try:
            return pl.BlockSpec(shape, index_map, pipeline_mode=pl.Buffered(1))
        except TypeError:  # older jax without pipeline_mode kwarg
            return pl.BlockSpec(shape, index_map)
    return pl.BlockSpec(shape, index_map)


# ------------------------------ wrapper --------------------------------------

def positionwise_ffn(x, gamma, beta, w1, b1, w2, b2, *, eps=1e-6,
                     activation="relu", tile_rows=None, tile_ff=None,
                     compute_dtype=jnp.bfloat16):
    """x: (batch, seq, d_model); w1: (d_model, d_ff); w2: (d_ff, d_model).

    For best performance pass w1/w2 already cast to `compute_dtype` (cast once
    at model init); the wrapper only casts if the dtype differs.
    """
    if activation not in ("relu", "gelu"):
        raise ValueError(f"unsupported activation: {activation}")
    B, S, D = x.shape
    d_ff = w1.shape[1]
    rows = B * S
    x2 = x.reshape(rows, D)

    vmem_cap, mxu_m, min_steps = _tpu_generation_params()
    w_itemsize = jnp.dtype(compute_dtype).itemsize
    budget = int(0.80 * vmem_cap)                    # headroom for compiler temps

    if tile_rows is None:
        tile_rows = _choose_tile_rows(rows, mxu_m, min_steps)
    if tile_ff is None:
        tile_ff = _choose_tile_ff(d_ff, tile_rows, D, x.dtype.itemsize,
                                  w_itemsize, budget)
        while tile_ff is None and tile_rows > 8:
            tile_rows = max(8, tile_rows // 2)
            tile_ff = _choose_tile_ff(d_ff, tile_rows, D, x.dtype.itemsize,
                                      w_itemsize, budget)
        if tile_ff is None:
            # TODO(synk): d_ff not a multiple of 128 and too large for VMEM;
            # would need in-kernel masking of the ragged ff tail.
            tile_ff = d_ff
    if d_ff % tile_ff != 0:
        raise ValueError("tile_ff must divide d_ff")
    n_ff = d_ff // tile_ff
    single_w = (n_ff == 1)

    # Hoisted casts: no-ops if caller already provides compute_dtype weights.
    w1c = w1 if w1.dtype == compute_dtype else w1.astype(compute_dtype)
    w2c = w2 if w2.dtype == compute_dtype else w2.astype(compute_dtype)
    gamma2 = gamma.reshape(1, D).astype(jnp.float32)
    beta2 = beta.reshape(1, D).astype(jnp.float32)
    b1_2 = b1.reshape(1, d_ff).astype(jnp.float32)
    b2_2 = b2.reshape(1, D).astype(jnp.float32)

    grid = (pl.cdiv(rows, tile_rows), n_ff)
    const = lambda i, k: (0, 0)

    needed = _vmem_needed(tile_rows, tile_ff, D, x.dtype.itemsize, w_itemsize, n_ff)
    vmem_limit = int(min(0.90 * vmem_cap, max(needed + (8 << 20), 32 << 20)))

    cost = pl.CostEstimate(
        flops=4 * rows * D * d_ff,                                  # two matmuls
        transcendentals=rows,                                       # rsqrt per row
        bytes_accessed=(2 * rows * D * x.dtype.itemsize             # x in + out
                        + 2 * D * d_ff * w_itemsize                 # w1 + w2
                        + (3 * D + d_ff) * 4),                      # gamma/beta/b1/b2
    )

    out = pl.pallas_call(
        functools.partial(_ffn_kernel, eps=eps, compute_dtype=compute_dtype,
                          activation=activation),
        out_shape=jax.ShapeDtypeStruct((rows, D), x.dtype),
        grid_spec=pltpu.PrefetchScalarGridSpec(
            num_scalar_prefetch=0,
            grid=grid,
            in_specs=[
                pl.BlockSpec((tile_rows, D), lambda i, k: (i, 0)),          # x rows
                _spec((1, D), const, single_buffer=True),                   # gamma
                _spec((1, D), const, single_buffer=True),                   # beta
                _spec((D, tile_ff), lambda i, k: (0, k),
                      single_buffer=single_w),                              # w1 tile
                _spec((1, tile_ff), lambda i, k: (0, k),
                      single_buffer=single_w),                              # b1 tile
                _spec((tile_ff, D), lambda i, k: (k, 0),
                      single_buffer=single_w),                              # w2 tile
                _spec((1, D), const, single_buffer=True),                   # b2
            ],
            out_specs=pl.BlockSpec((tile_rows, D), lambda i, k: (i, 0)),
            scratch_shapes=[
                pltpu.VMEM((tile_rows, D), compute_dtype),   # cached LayerNorm out
                pltpu.VMEM((tile_rows, D), jnp.float32),     # output accumulator
            ],
        ),
        compiler_params=pltpu.CompilerParams(
            dimension_semantics=("parallel", "arbitrary"),
            vmem_limit_bytes=vmem_limit),
        cost_estimate=cost,
    )(x2, gamma2, beta2, w1c, b1_2, w2c, b2_2)

    return out.reshape(B, S, D)


# ----------------------------- references -----------------------------------

def _reference_mixed(x, gamma, beta, w1, b1, w2, b2, eps=1e-6,
                     compute_dtype=jnp.bfloat16):
    """Mirrors the kernel math (bf16 matmul operands, f32 accumulation)."""
    xf = x.astype(jnp.float32)
    mean = jnp.mean(xf, axis=-1, keepdims=True)
    c = xf - mean
    var = jnp.mean(c * c, axis=-1, keepdims=True)
    xn = c * (jax.lax.rsqrt(var + eps) * gamma) + beta
    h = jnp.dot(xn.astype(compute_dtype), w1.astype(compute_dtype),
                preferred_element_type=jnp.float32) + b1
    h = jnp.maximum(h, 0.0)
    y = jnp.dot(h.astype(compute_dtype), w2.astype(compute_dtype),
                preferred_element_type=jnp.float32) + b2
    return (y + xf).astype(x.dtype)


def _reference_f32(x, gamma, beta, w1, b1, w2, b2, eps=1e-6):
    xf = x.astype(jnp.float32)
    mean = jnp.mean(xf, axis=-1, keepdims=True)
    var = jnp.mean((xf - mean) ** 2, axis=-1, keepdims=True)
    xn = (xf - mean) * jax.lax.rsqrt(var + eps) * gamma + beta
    h = jnp.maximum(xn @ w1 + b1, 0.0)
    y = h @ w2 + b2
    return (y + xf).astype(x.dtype)


if __name__ == "__main__":
    key = jax.random.PRNGKey(0)
    B, S, D, DFF = 2, 8, 32, 64  # batch, input_len, d_model, d_ff

    ks = jax.random.split(key, 5)
    x = jax.random.normal(ks[0], (B, S, D), dtype=jnp.float32)
    # Deterministic synthetic parameters (shapes match nn.Linear / nn.LayerNorm).
    w1 = jax.random.normal(ks[1], (D, DFF), dtype=jnp.float32) * (1.0 / jnp.sqrt(D))
    b1 = jax.random.normal(ks[2], (DFF,), dtype=jnp.float32) * 0.01
    w2 = jax.random.normal(ks[3], (DFF, D), dtype=jnp.float32) * (1.0 / jnp.sqrt(DFF))
    b2 = jax.random.normal(ks[4], (D,), dtype=jnp.float32) * 0.01
    gamma = jnp.ones((D,), dtype=jnp.float32)
    beta = jnp.zeros((D,), dtype=jnp.float32)

    # Hoisted one-time weight cast (as a model would do at init).
    w1_bf16 = w1.astype(jnp.bfloat16)
    w2_bf16 = w2.astype(jnp.bfloat16)

    out = positionwise_ffn(x, gamma, beta, w1_bf16, b1, w2_bf16, b2)
    out = jax.block_until_ready(out)
    assert out.shape == (B, S, D)

    # Tight check against a reference with the same mixed-precision math.
    ref_mixed = _reference_mixed(x, gamma, beta, w1, b1, w2, b2)
    assert jnp.allclose(out, ref_mixed, atol=5e-3, rtol=5e-3), "mismatch vs mixed ref"

    # Loose sanity check against the full-f32 PyTorch-equivalent math.
    ref_f32 = _reference_f32(x, gamma, beta, w1, b1, w2, b2)
    assert jnp.allclose(out, ref_f32, atol=5e-2, rtol=5e-2), "mismatch vs f32 ref"

    print("KERNEL_OK")
</pallas_src>

<mosaic_0001>
module attributes {stable_mosaic.version = 11 : i64} {
  func.func @_ffn_kernel(%arg0: i32, %arg1: i32, %arg2: memref<8x32xf32, #tpu.memory_space<vmem>>, %arg3: memref<1x32xf32, #tpu.memory_space<vmem>>, %arg4: memref<1x32xf32, #tpu.memory_space<vmem>>, %arg5: memref<32x64xbf16, #tpu.memory_space<vmem>>, %arg6: memref<1x64xf32, #tpu.memory_space<vmem>>, %arg7: memref<64x32xbf16, #tpu.memory_space<vmem>>, %arg8: memref<1x32xf32, #tpu.memory_space<vmem>>, %arg9: memref<8x32xf32, #tpu.memory_space<vmem>>, %arg10: memref<8x32xbf16, #tpu.memory_space<vmem>>, %arg11: memref<8x32xf32, #tpu.memory_space<vmem>>) attributes {dimension_semantics = [#tpu.dimension_semantics<parallel>, #tpu.dimension_semantics<arbitrary>], iteration_bounds = array<i64: 2, 1>, scalar_prefetch = 0 : i64, scratch_operands = 2 : i64, tpu.core_type = #tpu.core_type<tc>, window_params = [{transform_indices = @transform_0, window_bounds = array<i64: 8, 32>}, {pipeline_mode = #tpu.pipeline_mode<synchronous>, transform_indices = @transform_1, window_bounds = array<i64: 1, 32>}, {pipeline_mode = #tpu.pipeline_mode<synchronous>, transform_indices = @transform_2, window_bounds = array<i64: 1, 32>}, {pipeline_mode = #tpu.pipeline_mode<synchronous>, transform_indices = @transform_3, window_bounds = array<i64: 32, 64>}, {pipeline_mode = #tpu.pipeline_mode<synchronous>, transform_indices = @transform_4, window_bounds = array<i64: 1, 64>}, {pipeline_mode = #tpu.pipeline_mode<synchronous>, transform_indices = @transform_5, window_bounds = array<i64: 64, 32>}, {pipeline_mode = #tpu.pipeline_mode<synchronous>, transform_indices = @transform_6, window_bounds = array<i64: 1, 32>}, {transform_indices = @transform_7, window_bounds = array<i64: 8, 32>}]} {
    %c0_i32 = arith.constant 0 : i32
    %0 = arith.cmpi eq, %arg1, %c0_i32 : i32
    %1 = arith.extui %0 : i1 to i32
    %c0_i32_0 = arith.constant 0 : i32
    %2 = arith.cmpi ne, %1, %c0_i32_0 : i32
    scf.if %2 {
      %c0_16 = arith.constant 0 : index
      %c0_17 = arith.constant 0 : index
      %20 = vector.load %arg2[%c0_16, %c0_17] : memref<8x32xf32, #tpu.memory_space<vmem>>, vector<8x32xf32>
      %cst_18 = arith.constant dense<0.000000e+00> : vector<8xf32>
      %21 = vector.multi_reduction <add>, %20, %cst_18 [1] : vector<8x32xf32> to vector<8xf32>
      %22 = vector.shape_cast %21 : vector<8xf32> to vector<8x1xf32>
      %cst_19 = arith.constant 3.200000e+01 : f32
      %23 = vector.broadcast %cst_19 : f32 to vector<8x1xf32>
      %24 = arith.divf %22, %23 : vector<8x1xf32>
      %25 = vector.broadcast %24 : vector<8x1xf32> to vector<8x32xf32>
      %26 = arith.subf %20, %25 : vector<8x32xf32>
      %27 = arith.mulf %26, %26 : vector<8x32xf32>
      %cst_20 = arith.constant dense<0.000000e+00> : vector<8xf32>
      %28 = vector.multi_reduction <add>, %27, %cst_20 [1] : vector<8x32xf32> to vector<8xf32>
      %29 = vector.shape_cast %28 : vector<8xf32> to vector<8x1xf32>
      %cst_21 = arith.constant 3.200000e+01 : f32
      %30 = vector.broadcast %cst_21 : f32 to vector<8x1xf32>
      %31 = arith.divf %29, %30 : vector<8x1xf32>
      %cst_22 = arith.constant 9.99999997E-7 : f32
      %32 = vector.broadcast %cst_22 : f32 to vector<8x1xf32>
      %33 = arith.addf %31, %32 : vector<8x1xf32>
      %34 = math.rsqrt %33 : vector<8x1xf32>
      %c0_23 = arith.constant 0 : index
      %c0_24 = arith.constant 0 : index
      %35 = vector.load %arg3[%c0_23, %c0_24] : memref<1x32xf32, #tpu.memory_space<vmem>>, vector<1x32xf32>
      %36 = vector.broadcast %34 : vector<8x1xf32> to vector<8x32xf32>
      %37 = vector.broadcast %35 : vector<1x32xf32> to vector<8x32xf32>
      %38 = arith.mulf %36, %37 : vector<8x32xf32>
      %39 = arith.mulf %26, %38 : vector<8x32xf32>
      %c0_25 = arith.constant 0 : index
      %c0_26 = arith.constant 0 : index
      %40 = vector.load %arg4[%c0_25, %c0_26] : memref<1x32xf32, #tpu.memory_space<vmem>>, vector<1x32xf32>
      %41 = vector.broadcast %40 : vector<1x32xf32> to vector<8x32xf32>
      %42 = arith.addf %39, %41 : vector<8x32xf32>
      %43 = arith.truncf %42 : vector<8x32xf32> to vector<8x32xbf16>
      %c0_27 = arith.constant 0 : index
      %c0_28 = arith.constant 0 : index
      %44 = vector.load %arg10[%c0_27, %c0_28] : memref<8x32xbf16, #tpu.memory_space<vmem>>, vector<8x32xbf16>
      tpu.vector_store %arg10[%c0_27, %c0_28], %43 {strides = array<i32>} : memref<8x32xbf16, #tpu.memory_space<vmem>>, vector<8x32xbf16>,
      %cst_29 = arith.constant 0.000000e+00 : f32
      %45 = vector.broadcast %cst_29 : f32 to vector<8x32xf32>
      %c0_30 = arith.constant 0 : index
      %c0_31 = arith.constant 0 : index
      %46 = vector.load %arg11[%c0_30, %c0_31] : memref<8x32xf32, #tpu.memory_space<vmem>>, vector<8x32xf32>
      tpu.vector_store %arg11[%c0_30, %c0_31], %45 {strides = array<i32>} : memref<8x32xf32, #tpu.memory_space<vmem>>, vector<8x32xf32>,
    } else {
    }
    %c0 = arith.constant 0 : index
    %c0_1 = arith.constant 0 : index
    %3 = vector.load %arg10[%c0, %c0_1] : memref<8x32xbf16, #tpu.memory_space<vmem>>, vector<8x32xbf16>
    %c0_2 = arith.constant 0 : index
    %c0_3 = arith.constant 0 : index
    %4 = vector.load %arg5[%c0_2, %c0_3] : memref<32x64xbf16, #tpu.memory_space<vmem>>, vector<32x64xbf16>
    %cst = arith.constant dense<0.000000e+00> : vector<8x64xf32>
    %5 = tpu.matmul %3, %4, %cst {dimension_numbers = #tpu.dot_dimension_numbers<[1], [0], [0], [1], [0, 0, 1, 1], [], []>} : vector<8x32xbf16>, vector<32x64xbf16>, vector<8x64xf32> -> vector<8x64xf32>
    %c0_4 = arith.constant 0 : index
    %c0_5 = arith.constant 0 : index
    %6 = vector.load %arg6[%c0_4, %c0_5] : memref<1x64xf32, #tpu.memory_space<vmem>>, vector<1x64xf32>
    %7 = vector.broadcast %6 : vector<1x64xf32> to vector<8x64xf32>
    %8 = arith.addf %5, %7 : vector<8x64xf32>
    %cst_6 = arith.constant 0.000000e+00 : f32
    %9 = vector.broadcast %cst_6 : f32 to vector<8x64xf32>
    %10 = arith.maximumf %8, %9 : vector<8x64xf32>
    %11 = arith.truncf %10 : vector<8x64xf32> to vector<8x64xbf16>
    %c0_7 = arith.constant 0 : index
    %c0_8 = arith.constant 0 : index
    %12 = vector.load %arg11[%c0_7, %c0_8] : memref<8x32xf32, #tpu.memory_space<vmem>>, vector<8x32xf32>
    %c0_9 = arith.constant 0 : index
    %c0_10 = arith.constant 0 : index
    %13 = vector.load %arg7[%c0_9, %c0_10] : memref<64x32xbf16, #tpu.memory_space<vmem>>, vector<64x32xbf16>
    %cst_11 = arith.constant dense<0.000000e+00> : vector<8x32xf32>
    %14 = tpu.matmul %11, %13, %cst_11 {dimension_numbers = #tpu.dot_dimension_numbers<[1], [0], [0], [1], [0, 0, 1, 1], [], []>} : vector<8x64xbf16>, vector<64x32xbf16>, vector<8x32xf32> -> vector<8x32xf32>
    %15 = arith.addf %12, %14 : vector<8x32xf32>
    %c0_12 = arith.constant 0 : index
    %c0_13 = arith.constant 0 : index
    %16 = vector.load %arg11[%c0_12, %c0_13] : memref<8x32xf32, #tpu.memory_space<vmem>>, vector<8x32xf32>
    tpu.vector_store %arg11[%c0_12, %c0_13], %15 {strides = array<i32>} : memref<8x32xf32, #tpu.memory_space<vmem>>, vector<8x32xf32>,
    %c0_i32_14 = arith.constant 0 : i32
    %17 = arith.cmpi eq, %arg1, %c0_i32_14 : i32
    %18 = arith.extui %17 : i1 to i32
    %c0_i32_15 = arith.constant 0 : i32
    %19 = arith.cmpi ne, %18, %c0_i32_15 : i32
    scf.if %19 {
      %c0_16 = arith.constant 0 : index
      %c0_17 = arith.constant 0 : index
      %20 = vector.load %arg11[%c0_16, %c0_17] : memref<8x32xf32, #tpu.memory_space<vmem>>, vector<8x32xf32>
      %c0_18 = arith.constant 0 : index
      %c0_19 = arith.constant 0 : index
      %21 = vector.load %arg8[%c0_18, %c0_19] : memref<1x32xf32, #tpu.memory_space<vmem>>, vector<1x32xf32>
      %22 = vector.broadcast %21 : vector<1x32xf32> to vector<8x32xf32>
      %23 = arith.addf %20, %22 : vector<8x32xf32>
      %c0_20 = arith.constant 0 : index
      %c0_21 = arith.constant 0 : index
      %24 = vector.load %arg2[%c0_20, %c0_21] : memref<8x32xf32, #tpu.memory_space<vmem>>, vector<8x32xf32>
      %25 = arith.addf %23, %24 : vector<8x32xf32>
      %c0_22 = arith.constant 0 : index
      %c0_23 = arith.constant 0 : index
      %26 = vector.load %arg9[%c0_22, %c0_23] : memref<8x32xf32, #tpu.memory_space<vmem>>, vector<8x32xf32>
      tpu.vector_store %arg9[%c0_22, %c0_23], %25 {strides = array<i32>} : memref<8x32xf32, #tpu.memory_space<vmem>>, vector<8x32xf32>,
    } else {
    }
    return
  }
  func.func @transform_0(%arg0: i32, %arg1: i32) -> (i32, i32) {
    %c0_i32 = arith.constant 0 : i32
    %c0_i32_0 = arith.constant 0 : i32
    return %arg0, %c0_i32 : i32, i32
  }
  func.func @transform_1(%arg0: i32, %arg1: i32) -> (i32, i32) {
    %c0_i32 = arith.constant 0 : i32
    %c0_i32_0 = arith.constant 0 : i32
    %c0_i32_1 = arith.constant 0 : i32
    return %c0_i32, %c0_i32_0 : i32, i32
  }
  func.func @transform_2(%arg0: i32, %arg1: i32) -> (i32, i32) {
    %c0_i32 = arith.constant 0 : i32
    %c0_i32_0 = arith.constant 0 : i32
    %c0_i32_1 = arith.constant 0 : i32
    return %c0_i32, %c0_i32_0 : i32, i32
  }
  func.func @transform_3(%arg0: i32, %arg1: i32) -> (i32, i32) {
    %c0_i32 = arith.constant 0 : i32
    %c0_i32_0 = arith.constant 0 : i32
    return %c0_i32, %arg1 : i32, i32
  }
  func.func @transform_4(%arg0: i32, %arg1: i32) -> (i32, i32) {
    %c0_i32 = arith.constant 0 : i32
    %c0_i32_0 = arith.constant 0 : i32
    return %c0_i32, %arg1 : i32, i32
  }
  func.func @transform_5(%arg0: i32, %arg1: i32) -> (i32, i32) {
    %c0_i32 = arith.constant 0 : i32
    %c0_i32_0 = arith.constant 0 : i32
    return %arg1, %c0_i32 : i32, i32
  }
  func.func @transform_6(%arg0: i32, %arg1: i32) -> (i32, i32) {
    %c0_i32 = arith.constant 0 : i32
    %c0_i32_0 = arith.constant 0 : i32
    %c0_i32_1 = arith.constant 0 : i32
    return %c0_i32, %c0_i32_0 : i32, i32
  }
  func.func @transform_7(%arg0: i32, %arg1: i32) -> (i32, i32) {
    %c0_i32 = arith.constant 0 : i32
    %c0_i32_0 = arith.constant 0 : i32
    return %arg0, %c0_i32 : i32, i32
  }
}

</mosaic_0001>

<bundles_post_ra>
// kernel: tpu_custom_call.1
= control target key start
LH: loop header
LB: loop body
LE: loop exit
PB: predicated region body
PF: predicated region fallthrough
CT: control target
= control target key end

     0   :  { %12 = vsyncpa [#allocation5], 0  ;;  %s1062_s0 = inlined_call_operand.vmem [shape: f32[16,32], index: 0, kind: input, shape index: {}]   ;;  %s1063_s1 = inlined_call_operand.vmem [shape: f32[1,32], index: 1, kind: input, shape index: {}]   ;;  %s1064_s2 = inlined_call_operand.vmem [shape: f32[1,32], index: 2, kind: input, shape index: {}]   ;;  %s1065_s3 = inlined_call_operand.vmem [shape: bf16[32,64], index: 3, kind: input, shape index: {}]   ;;  %s1066_s4 = inlined_call_operand.vmem [shape: f32[1,64], index: 4, kind: input, shape index: {}]   ;;  %s1067_s5 = inlined_call_operand.vmem [shape: bf16[64,32], index: 5, kind: input, shape index: {}]   ;;  %s1068_s6 = inlined_call_operand.vmem [shape: f32[1,32], index: 6, kind: input, shape index: {}]   ;;  %s1069_s7 = inlined_call_operand.hbm [shape: f32[16,32], index: 7, kind: output, shape index: {}]  }
   0x1   :  { %14 = vsyncpa [#allocation5 + $0x1], 0  ;;  %s909_s24 = smov 0   ;;  %s911_s25 = smov 0  }
   0x2   :  { %s913_s26 = smov 0   ;;  %s915_s27 = smov 0  }
   0x3   :  { %s917_s28 = smov 0   ;;  %s919_s29 = smov 0  }
   0x4 LB: > { %s667_s30 = sadd.s32 4294967295, %s864_s29   ;;  %s668_s8 = sadd.s32 4294967294, %s864_s29   ;;  %s864_s29 = sphi %s919_s29, %s20_s29   ;;  %s860_s28 = sphi %s917_s28, %s1076_s28   ;;  %s856_s27 = sphi %s915_s27, %s1075_s27   ;;  %s852_s26 = sphi %s913_s26, %s1074_s26   ;;  %s848_s25 = sphi %s911_s25, %s1073_s25   ;;  %s844_s24 = sphi %s909_s24, %s1072_s24  }
   0x5   : > { %s32_s9 = sadd.s32 1, %s860_s28  ;;  %s206_s10 = sadd.s32 1, %s852_s26 }
   0x6   : > { %p34_p0 = scmp.ge.s32.totalorder %s32_s9, 2  ;;  %p216_p1 = scmp.ne.s32.totalorder %s852_s26, %s848_s25 }
   0x7   : > { %p217_p2 = scmp.eq.s32.totalorder %s667_s30, 1  ;;  %p222_p3 = scmp.ne.s32.totalorder %s848_s25, %s844_s24 }
   0x8   : > { %s1078_s9 = smov (%p34_p0, %s32_s9), 0  ;;  %p223_p5 = scmp.eq.s32.totalorder %s668_s8, 1 }
   0x9   : > { %p949_p4 = por %p217_p2, %p216_p1  ;;  %s203_s12 = ssub.s32 %s860_s28, %s1078_s9 }
   0xa   : > { %p674_p6 = scmp.ge.s32.totalorder %s864_s29, 1  ;;  %p204_p7 = scmp.eq.s32.totalorder %s203_s12, 0 }
   0xb   : > { %p956_p8 = por %p223_p5, %p222_p3  ;;  %p279_p9 = scmp.lt.s32.totalorder %s864_s29, 3 }
   0xc   : > { %s962_s14 = scalar_select %p204_p7, %s852_s26, %s206_s10  }
   0xd   : > { %p280_p10 = pnand %p674_p6, %p279_p9 }
   0xe   : > { %p322_p11 = scmp.lt.s32.totalorder (!%p280_p10), %s856_s27, 1  ;;  %vm345_vm0 = vcmask (!%p280_p10), 261120   ;;  %v778_v7 = vld [vmem:[%s1065_s3] sm:$0xff] (!%p280_p10)   ;;  %v866_v8 = vmov (!%p280_p10), 0.0   ;;  %v779_v9 = vld [vmem:[%s1065_s3 + $0x8] sm:$0xff] (!%p280_p10)   ;;  %vm867_vm1 = vmmov (!%p280_p10), 0  }
   0xf   : > { %283 = sbr.rel (%p280_p10) target bundleno = 808 (0x328), region = 48  ;;  %701 = vmatprep.subr.bf16.mxu0 (!%p280_p10), %v866_v8  ;;  %379 = vst.msk [vmem:[#allocation3] sm:$0xff] (!%p280_p10), %vm345_vm0, %v866_v8  ;;  %709 = vmatprep.subr.bf16.mxu1 (!%p280_p10), %v866_v8  ;;  %v780_v10 = vld [vmem:[%s1067_s5] sm:$0xff] (!%p280_p10)   ;;  %v781_v11 = vld [vmem:[%s1067_s5 + $0x8] sm:$0xff] (!%p280_p10)   ;;  %vm377_vm2 = vcmask (!%p280_p10), 257024   ;;  %v782_v23 = vld [vmem:[%s1067_s5 + $0x10] sm:$0xff] (!%p280_p10)  }
  0x10   : > { %702 = vmatpush3.bf16.msra.mxu0 (!%p280_p10), %v778_v7  ;;  %705 = vmatprep.mubr.msk.bf16.mxu0 (!%p280_p10), %vm867_vm1, %v866_v8  ;;  %v677_v15 = vld [vmem:[%s1063_s1] ss:$0 sm:$0xff] (!%p280_p10)  ;;  %v783_v24 = vld [vmem:[%s1067_s5 + $0x18] sm:$0xff] (!%p280_p10)   ;;  %vm483_vm3 = vcmask (!%p280_p10), 523264   ;;  %s319_s8 = sand.u32 (!%p280_p10), 1, %s848_s25  }
  0x11   : > { %703 = vmatprep.subr.bf16.mxu0 (!%p280_p10), %v866_v8  ;;  %717 = vmatprep.mubr.msk.bf16.mxu1 (!%p280_p10), %vm867_vm1, %v866_v8  ;;  %v678_v18 = vld [vmem:[%s1064_s2] ss:$0 sm:$0xff] (!%p280_p10)  ;;  %s675_s10 = sshll.u32 (!%p280_p10), %s319_s8, 3  ;;  %s545_s22 = scalar_lea.sflag (!%p280_p10), [#allocation5], %s319_s8 }
  0x12   : > { %710 = vmatpush3.bf16.msra.mxu1 (!%p280_p10), %v780_v10  ;;  %v679_v25 = vld [vmem:[%s1066_s4] ss:$0 sm:$0xff] (!%p280_p10)  ;;  %s321_s17 = scalar_lea.vmem (!%p280_p10), [#allocation4], %s675_s10 }
  0x13   : > { %711 = vmatprep.subr.bf16.mxu1 (!%p280_p10), %v866_v8  ;;  %v688_v39 = vld [vmem:[%s1068_s6] ss:$0 sm:$0xff] (!%p280_p10)  ;;  %s558_s18 = sshll.u32 (!%p280_p10), %s321_s17, 4  ;;  %s1016_s18 = int_to_ptr.vmem [resolvable:$true] %s558_s18 }
  0x14   : > { %704 = vmatpush3.bf16.msra.mxu0 (!%p280_p10), %v779_v9  ;;  %s786_s23 = scalar_lea.vmem (!%p280_p10), %s1016_s18, 128 }
  0x15   : > { %p787_p12 = scmp.ne.s32.totalorder (!%p280_p10), %s1016_s18, %s786_s23 }
  0x16   : > { %s323_s15 = scalar_select %p322_p11, %s856_s27, 1  ;;  %712 = vmatpush3.bf16.msra.mxu1 %v781_v11  ;;  %v450_v33 = vld [vmem:[#allocation3] sm:$0xff] }
  0x17   : > { %713 = vmatprep.subr.bf16.mxu1 %v866_v8  ;;  %p788_p13 = pnand %p787_p12, %p949_p4 }
  0x18   : > { %s676_s16 = sshll.u32 %s323_s15, 3 }
  0x19   : > { %s325_s19 = scalar_lea.vmem %s1062_s0, %s676_s16  ;;  %s690_s16 = sshll.u32 %s856_s27, 7 }
  0x1a   : > { %v969_v0 = vld [vmem:[%s325_s19] sm:$0xff]  ;;  %714 = vmatpush3.bf16.msra.mxu1 %v782_v23  ;;  %s1014_s21 = scalar_lea.hbm %s1069_s7, %s690_s16  ;;  %p789_p0 = pneg %p788_p13 }
  0x1b   : > { %v346_v1 = vsel %vm345_vm0, %v969_v0, 0.0  ;;  %715 = vmatprep.subr.bf16.mxu1 %v866_v8  ;;  %s868_s27 = smov [#allocation4]  }
  0x1c   : > { %347 = vadd.xlane.f32.xlu0 %v346_v1  ;;  %s790_s30 = sshll.u32 %s868_s27, 4  ;;  %s791_s30 = int_to_ptr.vmem [resolvable:$false] %s790_s30 }
  0x1d   : > { %s792_s10 = scalar_lea.vmem %s791_s30, 256  ;;  %p793_p1 = scmp.lt.s32.totalorder %s1016_s18, %s791_s30 }
  0x1e   : > { %716 = vmatpush3.bf16.msra.mxu1 %v783_v24  ;;  %p794_p2 = scmp.lt.s32.totalorder %s792_s10, %s786_s23 }
  0x20   : > { %p795_p3 = por %p794_p2, %p793_p1 }
  0x22   : > { %p796_p5 = pnand %p795_p3, %p789_p0 }
  0xa9   : > { %v348_v2 = vpop.xlane.xlu0 %347 }
  0xaa   : > { %v350_v3 = vmul.f32 0.03125, %v348_v2 }
  0xac   : > { %v351_v4 = vsub.f32 %v969_v0, %v350_v3 }
  0xae   : > { %v352_v5 = vmul.f32 %v351_v4, %v351_v4 }
  0xb0   : > { %v353_v6 = vsel %vm345_vm0, %v352_v5, 0.0 }
  0xb1   : > { %354 = vadd.xlane.f32.xlu0 %v353_v6 }
 0x13e   : > { %v355_v12 = vpop.xlane.xlu0 %354 }
 0x13f   : > { %v356_v13 = vmul.f32 0.03125, %v355_v12 }
 0x141   : > { %v357_v14 = vadd.f32 1e-06, %v356_v13 }
 0x143   : > { %784 = vrsqrt.f32 %v357_v14 }
 0x14d   : > { %v785_v16 = vpop.eup %784 }
 0x14e   : > { %v366_v17 = vmul.f32 %v785_v16, %v677_v15 }
 0x150   : > { %v367_v19 = vmul.f32 %v366_v17, %v351_v4 }
 0x152   : > { %v375_v20 = vadd.f32 %v678_v18, %v367_v19 }
 0x154   : > { %v376_v21 = vpack.c.bf16 %v375_v20, %v375_v20 }
 0x156   : > { %378 = vst.msk [vmem:[#allocation2] sm:$0xf] %vm377_vm2, %v376_v21 }
 0x15d   : > { %v380_v22 = vld [vmem:[#allocation2] sm:$0xf] }
 0x15e   : > { %706 = vmatmul.mubr.msk.bf16.vlgmr.msra.gmra.mrb[0].mxu0 %vm345_vm0, %v380_v22 }
 0x231   : > { %v442_v26 = vpop.f32.mrb[0].mxu0 }
 0x232   : > { %v443_v27 = vadd.f32 %v679_v25, %v442_v26  ;;  %v707_v28 = vpop.f32.mrb[1].mxu0 }
 0x233   : > { %v445_v29 = vpop.f32.mrb[2].mxu0 }
 0x234   : > { %v448_v30 = vmax.f32 %v443_v27, 0.0  ;;  %v708_v31 = vpop.f32.mrb[3].mxu0 }
 0x236   : > { %v449_v32 = vpack.c.bf16 %v448_v30, %v448_v30 }
 0x238   : > { %718 = vmatmul.mubr.msk.bf16.vlgmr.msra.gmra.mrb[0].mxu1 %vm483_vm3, %v449_v32 }
 0x30b   : > { %v521_v34 = vpop.f32.mrb[0].mxu1 }
 0x30c   : > { %v527_v35 = vadd.f32 %v521_v34, %v450_v33  ;;  %v719_v36 = vpop.f32.mrb[1].mxu1 }
 0x30d   : > { %v524_v37 = vpop.f32.mrb[2].mxu1 }
 0x30e   : > { %528 = vst.msk [vmem:[#allocation3] sm:$0xff] %vm345_vm0, %v527_v35  ;;  %v720_v38 = vpop.f32.mrb[3].mxu1 }
 0x315   : > { %v532_v40 = vld [vmem:[#allocation3] sm:$0xff] }
 0x316   : > { %v540_v41 = vadd.f32 %v688_v39, %v532_v40 }
 0x318   : > { %v542_v42 = vadd.f32 %v540_v41, %v969_v0 }
 0x31a   : > { %543 = vst.msk [vmem:[%s321_s17] sm:$0xff] %vm345_vm0, %v542_v42 }
 0x31b   : > { %799 = shalt.err (!%p796_p5)
}
 0x31c   : > { %s800_s8 = scalar_lea.hbm %s1014_s21, 128  ;;  %s804_s16 = scalar_lea.hbm %s1069_s7, 256 }
 0x31d   : > { %p801_p6 = scmp.ne.s32.totalorder %s1014_s21, %s800_s8  ;;  %p805_p10 = scmp.lt.u32.totalorder %s1014_s21, %s1069_s7 }
 0x31e   : > { %p806_p11 = scmp.lt.u32.totalorder %s804_s16, %s800_s8  ;;  %p808_p13 = scmp.lt.u32.totalorder %s800_s8, %s1014_s21 }
 0x31f   : > { %p802_p7 = pnand %p801_p6, %p949_p4 }
 0x320   : > { %p807_p12 = por %p806_p11, %p805_p10 }
 0x321   : > { %p803_p9 = pneg %p802_p7 }
 0x322   : > { %p809_p0 = por %p808_p13, %p807_p12 }
 0x324   : > { %p810_p1 = pnand %p809_p0, %p803_p9 }
 0x326   : > { %813 = shalt.err (!%p810_p1)
}
 0x327   : > { %721 = dma.vmem_to_hbm [thread:$0]  (%p949_p4), %s1016_s18, 128, %s1014_s21, %s545_s22  }
 0x328 PF: > { %p727_p2 = scmp.ge.s32.totalorder %s864_s29, 2  ;;  %s570_s20 = sand.u32 1, %s844_s24  }
 0x329   : > { %s571_s23 = scalar_lea.sflag [#allocation5], %s570_s20 }
 0x32a   : > { %p724_p3 = pnand %p727_p2, %p956_p8 }
 0x32c   : > { %839 = dma.done.wait (!%p724_p3), %s571_s23, 128  }
 0x32d   : > { %841 = vsyncadd (!%p724_p3), %s571_s23, 4294967168  ;;  %s20_s29 = sadd.s32 1, %s864_s29   ;;  %s1072_s24 = smov %s848_s25 }
 0x32e   : > { %p17_p5 = scmp.ge.s32.totalorder %s20_s29, 4   ;;  %s1073_s25 = smov %s852_s26 }
 0x32f   : > { %s1074_s26 = smov %s962_s14  ;;  %s1075_s27 = smov %s860_s28 }
 0x330   : > { %s1076_s28 = smov %s1078_s9  ;;  %19 = sbr.rel (!%p17_p5) target bundleno = 4 (0x4), region = 100 }
 0x337   :  { %576 = vsyncpa [#allocation5], 1 }
 0x338   :  { %578 = vsyncpa [#allocation5 + $0x1], 1 }

</bundles_post_ra>
